<compile_context>
chip_gen: v5e
topology: v5e:2x2
jax: 0.10.0
libtpu: 0.0.40
codegen_flags: <defaults>
</compile_context>

<pallas_src>
import jax
import jax.numpy as jnp
from jax.experimental import pallas as pl
from jax.experimental.pallas import tpu as pltpu


def _round_up(n, m):
    return ((n + m - 1) // m) * m


def _cdiv(a, b):
    return (a + b - 1) // b


def _vmem_capacity_bytes():
    """Per-core VMEM capacity; conservative 64 MiB (v7x) fallback if the query fails."""
    try:
        info = pltpu.get_tpu_info()
        cap = getattr(info, "vmem_capacity_bytes", None)
        if cap:
            return int(cap)
    except Exception:
        pass
    return 64 * 1024 * 1024


def make_bl_fused_weight(w1, w2, dtype):
    """Wk[(i,j),(o,k)] = W1[o,i] * W2[j,k]. Build once per parameter set and reuse."""
    out0, in0 = w1.shape
    in1, out1 = w2.shape
    wk = jnp.einsum("oi,jk->ijok", w1.astype(jnp.float32), w2.astype(jnp.float32))
    return wk.reshape(in0 * in1, out0 * out1).astype(dtype)


def _bl_kernel(x_ref, wk_ref, b_ref, y_ref):
    # x_ref:  (tb, K)      streamed batch block (flattened input matrices)
    # wk_ref: (K, tn)      fused bilinear weight tile (resident if n_n == 1)
    # b_ref:  (1, tn)      bias tile (f32)
    # y_ref:  (tb, tn)     lane-dense output block
    acc = jnp.dot(x_ref[...], wk_ref[...], preferred_element_type=jnp.float32)
    acc = acc + b_ref[...]                 # bias on the f32 accumulator
    y_ref[...] = acc.astype(y_ref.dtype)   # single downcast at the store


def bl_forward(x, w1, w2, b, *, wk=None, operand_dtype=None, max_block_b=4096):
    """Bilinear layer forward: Y[i] = W1 @ X[i] @ W2 + b (squeeze to (B, out0) if out1 == 1)."""
    B, in0, in1 = x.shape
    out0 = w1.shape[0]
    out1 = w2.shape[1]
    K = in0 * in1
    N = out0 * out1
    out_dtype = x.dtype
    mxu_dtype = jnp.dtype(operand_dtype if operand_dtype is not None else x.dtype)

    # Fused weight (caller may pass a cached one to amortize over many calls).
    if wk is None:
        wk = make_bl_fused_weight(w1, w2, mxu_dtype)
    else:
        wk = wk.astype(mxu_dtype)

    # --- Lane-dense output: pad N up to a multiple of 128 (zero columns, sliced off after).
    N_pad = _round_up(N, 128)
    b_flat = b.reshape(1, N).astype(jnp.float32)
    if N_pad != N:
        wk = jnp.pad(wk, ((0, 0), (0, N_pad - N)))
        b_flat = jnp.pad(b_flat, ((0, 0), (0, N_pad - N)))

    x_flat = x.reshape(B, K).astype(mxu_dtype)

    x_isz = mxu_dtype.itemsize
    w_isz = mxu_dtype.itemsize
    o_isz = jnp.dtype(out_dtype).itemsize
    b_isz = 4

    # --- VMEM planning -----------------------------------------------------------------
    budget = int(_vmem_capacity_bytes() * 0.75)   # ~48 MiB v7x, ~96 MiB v5e/v6e

    # Keep Wk fully resident when it fits in ~1/3 of the budget; otherwise tile N
    # (lane-dense multiples of 128) and stream (double-buffer) the Wk tiles.
    wk_full_bytes = K * N_pad * w_isz
    if wk_full_bytes <= budget // 3:
        tn = N_pad
    else:
        per_tile_col = 2 * K * w_isz                      # double-buffered weight column cost
        tn = max(128, ((budget // 3) // (per_tile_col * 128)) * 128)
        tn = min(tn, N_pad)
    n_n = _cdiv(N_pad, tn)
    if n_n * tn != N_pad:                                 # make tn divide the padded N evenly
        extra = n_n * tn - N_pad
        wk = jnp.pad(wk, ((0, 0), (0, extra)))
        b_flat = jnp.pad(b_flat, ((0, 0), (0, extra)))
        N_pad = n_n * tn

    wk_bufs = 1 if n_n == 1 else 2                        # single-buffer the resident weight
    wk_vmem = wk_bufs * K * tn * w_isz
    bias_vmem = wk_bufs * tn * b_isz

    # Largest sublane-aligned batch tile that fits (double-buffered X in + Y out).
    per_row = 2 * K * x_isz + 2 * tn * o_isz
    tb_max = max(8, ((budget - wk_vmem - bias_vmem) // max(per_row, 1)) // 8 * 8)
    tb_max = min(tb_max, max_block_b)

    # Balance the batch tile across steps to keep padding < 8 rows per step.
    n_b = _cdiv(max(B, 1), tb_max)
    tb = _round_up(_cdiv(B, n_b), 8)
    b_pad = n_b * tb
    if b_pad != B:
        x_flat = jnp.pad(x_flat, ((0, b_pad - B), (0, 0)))

    # Computed VMEM limit with headroom (instead of a hard-coded 32 MiB).
    need = wk_vmem + bias_vmem + 2 * tb * K * x_isz + 2 * tb * tn * o_isz
    vmem_limit = int(min(budget, max(4 * 1024 * 1024, int(need * 1.25))))

    cost = pl.CostEstimate(
        flops=2 * b_pad * K * N_pad,
        transcendentals=0,
        bytes_accessed=b_pad * K * x_isz + K * N_pad * w_isz + b_pad * N_pad * o_isz,
    )

    wk_mode = pl.Buffered(wk_bufs)
    y_flat = pl.pallas_call(
        _bl_kernel,
        out_shape=jax.ShapeDtypeStruct((b_pad, N_pad), out_dtype),
        grid_spec=pltpu.PrefetchScalarGridSpec(
            num_scalar_prefetch=0,
            grid=(n_b, n_n),
            in_specs=[
                pl.BlockSpec((tb, K), lambda i, j: (i, 0)),                          # X (streamed)
                pl.BlockSpec((K, tn), lambda i, j: (0, j), pipeline_mode=wk_mode),   # fused weight
                pl.BlockSpec((1, tn), lambda i, j: (0, j), pipeline_mode=wk_mode),   # bias (f32)
            ],
            out_specs=pl.BlockSpec((tb, tn), lambda i, j: (i, j)),
        ),
        compiler_params=pltpu.CompilerParams(
            dimension_semantics=("parallel", "parallel"),
            vmem_limit_bytes=vmem_limit,
        ),
        cost_estimate=cost,
    )(x_flat, wk, b_flat)

    y_flat = y_flat[:B, :N]
    if out1 == 1:
        return y_flat.reshape(B, out0)     # lane-dense already; no extra squeeze pass
    return y_flat.reshape(B, out0, out1)


if __name__ == "__main__":
    # Small shapes consistent with the module.
    B = 2
    input_dim = (4, 16)    # (in0, in1)
    output_dim = (8, 32)   # (out0, out1)

    key = jax.random.PRNGKey(0)
    kx, k1, k2, kb = jax.random.split(key, 4)

    x = jax.random.normal(kx, (B, input_dim[0], input_dim[1]), dtype=jnp.float32)
    w1 = jax.random.normal(k1, (output_dim[0], input_dim[0]), dtype=jnp.float32) * 0.1
    w2 = jax.random.normal(k2, (input_dim[1], output_dim[1]), dtype=jnp.float32) * 0.1
    b = jax.random.normal(kb, (output_dim[0], output_dim[1]), dtype=jnp.float32) * 0.1

    # General (out1 > 1) path.
    y = jax.block_until_ready(bl_forward(x, w1, w2, b))
    ref = jnp.einsum("oi,bij,jk->bok", w1, x, w2) + b
    assert y.shape == ref.shape
    assert jnp.allclose(y, ref, atol=1e-3, rtol=1e-3)

    # out1 == 1 squeeze path (N = out0 = 8 gets lane-padded to 128 inside the wrapper).
    w2s = jax.random.normal(k2, (input_dim[1], 1), dtype=jnp.float32) * 0.1
    bs = jax.random.normal(kb, (output_dim[0], 1), dtype=jnp.float32) * 0.1
    ys = jax.block_until_ready(bl_forward(x, w1, w2s, bs))
    refs = jnp.squeeze(jnp.einsum("oi,bij,jk->bok", w1, x, w2s) + bs, axis=-1)
    assert ys.shape == refs.shape
    assert jnp.allclose(ys, refs, atol=1e-3, rtol=1e-3)

    print("KERNEL_OK")
</pallas_src>

<mosaic_0001>
module attributes {stable_mosaic.version = 11 : i64} {
  func.func @_bl_kernel(%arg0: i32, %arg1: i32, %arg2: memref<8x64xf32, #tpu.memory_space<vmem>>, %arg3: memref<64x256xf32, #tpu.memory_space<vmem>>, %arg4: memref<1x256xf32, #tpu.memory_space<vmem>>, %arg5: memref<8x256xf32, #tpu.memory_space<vmem>>) attributes {dimension_semantics = [#tpu.dimension_semantics<parallel>, #tpu.dimension_semantics<parallel>], iteration_bounds = array<i64: 1, 1>, scalar_prefetch = 0 : i64, scratch_operands = 0 : i64, tpu.core_type = #tpu.core_type<tc>, window_params = [{transform_indices = @transform_0, window_bounds = array<i64: 8, 64>}, {pipeline_mode = #tpu.pipeline_mode<synchronous>, transform_indices = @transform_1, window_bounds = array<i64: 64, 256>}, {pipeline_mode = #tpu.pipeline_mode<synchronous>, transform_indices = @transform_2, window_bounds = array<i64: 1, 256>}, {transform_indices = @transform_3, window_bounds = array<i64: 8, 256>}]} {
    %c0 = arith.constant 0 : index
    %c0_0 = arith.constant 0 : index
    %0 = vector.load %arg2[%c0, %c0_0] : memref<8x64xf32, #tpu.memory_space<vmem>>, vector<8x64xf32>
    %c0_1 = arith.constant 0 : index
    %c0_2 = arith.constant 0 : index
    %1 = vector.load %arg3[%c0_1, %c0_2] : memref<64x256xf32, #tpu.memory_space<vmem>>, vector<64x256xf32>
    %cst = arith.constant dense<0.000000e+00> : vector<8x256xf32>
    %2 = tpu.matmul %0, %1, %cst {dimension_numbers = #tpu.dot_dimension_numbers<[1], [0], [0], [1], [0, 0, 1, 1], [], []>} : vector<8x64xf32>, vector<64x256xf32>, vector<8x256xf32> -> vector<8x256xf32>
    %c0_3 = arith.constant 0 : index
    %c0_4 = arith.constant 0 : index
    %3 = vector.load %arg4[%c0_3, %c0_4] : memref<1x256xf32, #tpu.memory_space<vmem>>, vector<1x256xf32>
    %4 = vector.broadcast %3 : vector<1x256xf32> to vector<8x256xf32>
    %5 = arith.addf %2, %4 : vector<8x256xf32>
    %c0_5 = arith.constant 0 : index
    %c0_6 = arith.constant 0 : index
    %6 = vector.load %arg5[%c0_5, %c0_6] : memref<8x256xf32, #tpu.memory_space<vmem>>, vector<8x256xf32>
    tpu.vector_store %arg5[%c0_5, %c0_6], %5 {strides = array<i32>} : memref<8x256xf32, #tpu.memory_space<vmem>>, vector<8x256xf32>,
    return
  }
  func.func @transform_0(%arg0: i32, %arg1: i32) -> (i32, i32) {
    %c0_i32 = arith.constant 0 : i32
    %c0_i32_0 = arith.constant 0 : i32
    return %arg0, %c0_i32 : i32, i32
  }
  func.func @transform_1(%arg0: i32, %arg1: i32) -> (i32, i32) {
    %c0_i32 = arith.constant 0 : i32
    %c0_i32_0 = arith.constant 0 : i32
    return %c0_i32, %arg1 : i32, i32
  }
  func.func @transform_2(%arg0: i32, %arg1: i32) -> (i32, i32) {
    %c0_i32 = arith.constant 0 : i32
    %c0_i32_0 = arith.constant 0 : i32
    return %c0_i32, %arg1 : i32, i32
  }
  func.func @transform_3(%arg0: i32, %arg1: i32) -> (i32, i32) {
    %c0_i32 = arith.constant 0 : i32
    return %arg0, %arg1 : i32, i32
  }
}

</mosaic_0001>

<bundles_post_ra>
// kernel: tpu_custom_call.1
= control target key start
LH: loop header
LB: loop body
LE: loop exit
PB: predicated region body
PF: predicated region fallthrough
CT: control target
= control target key end

     0   :  { %8 = vsyncpa [#allocation3], 0  ;;  %s293_s0 = inlined_call_operand.hbm [shape: f32[8,64], index: 0, kind: input, shape index: {}]   ;;  %s294_s1 = inlined_call_operand.hbm [shape: f32[64,256], index: 1, kind: input, shape index: {}]   ;;  %s295_s2 = inlined_call_operand.hbm [shape: f32[1,256], index: 2, kind: input, shape index: {}]   ;;  %s296_s3 = inlined_call_operand.hbm [shape: f32[8,256], index: 3, kind: output, shape index: {}]  }
   0x1   :  { %9 = vsyncpa [#allocation6], 0  ;;  %s26_s14 = sshll.u32 %s294_s1, 4  ;;  %s27_s14 = int_to_ptr.hbm [resolvable:$true] %s26_s14 }
   0x2   :  { %10 = vsyncpa [#allocation4], 0  ;;  %s255_s15 = smov [#allocation5]   ;;  %s16_s19 = sshll.u32 %s293_s0, 4  ;;  %s17_s19 = int_to_ptr.hbm [resolvable:$true] %s16_s19 }
   0x3   :  { %s28_s16 = sshll.u32 %s255_s15, 4  ;;  %s256_s20 = smov 256   ;;  %s29_s16 = int_to_ptr.vmem [resolvable:$true] %s28_s16 }
   0x4   :  { %s257_s21 = smov 16   ;;  %s258_s22 = smov [#allocation2]  }
   0x5   :  { %34 = dma.hbm_to_vmem [thread:$0]  %s27_s14, 2048, %s29_s16, [#allocation6], %s256_s20, %s256_s20, %s257_s21  }
   0x6   :  { %s18_s23 = sshll.u32 %s258_s22, 4  ;;  %s40_s26 = sshll.u32 %s295_s2, 4  ;;  %s19_s23 = int_to_ptr.vmem [resolvable:$true] %s18_s23  ;;  %s41_s26 = int_to_ptr.hbm [resolvable:$true] %s40_s26 }
   0x7   :  { %21 = dma.hbm_to_vmem [thread:$0]  %s17_s19, 128, %s19_s23, [#allocation3]  }
   0x8   :  { %s259_s1 = smov [#allocation7]  }
   0x9   :  { %s42_s27 = sshll.u32 %s259_s1, 4  ;;  %s43_s27 = int_to_ptr.vmem [resolvable:$true] %s42_s27 }
   0xa   :  { %45 = dma.hbm_to_vmem [thread:$0]  %s41_s26, 32, %s43_s27, [#allocation6]  }
   0xb   :  { %249 = dma.done.wait [#allocation3], 128  }
   0xc   :  { %250 = vsyncadd [#allocation3], 4294967168 }
   0xd   :  { %251 = dma.done.wait [#allocation6], 2080  }
   0xe   :  { %252 = vsyncadd [#allocation6], 4294965216  ;;  %v73_v0 = vld [vmem:[#allocation5 + $0x70] sm:$0xff]  ;;  %v74_v1 = vld [vmem:[#allocation5 + $0x78] sm:$0xff]  ;;  %vm81_vm0 = vcmask 523264   ;;  %s260_s0 = smov [#allocation8]  }
   0xf   :  { %v71_v2 = vld [vmem:[#allocation5 + $0x60] sm:$0xff]  ;;  %93 = vmatpush.msra.mxu0 %v73_v0  ;;  %113 = vmatpush.msra.mxu1 %v74_v1  ;;  %v72_v3 = vld [vmem:[#allocation5 + $0x68] sm:$0xff]  ;;  %v69_v4 = vld [vmem:[#allocation5 + $0x50] sm:$0xff]  ;;  %s132_s2 = sshll.u32 %s260_s0, 4  ;;  %s134_s30 = sshll.u32 %s296_s3, 4  ;;  %s133_s2 = int_to_ptr.vmem [resolvable:$true] %s132_s2  ;;  %s135_s30 = int_to_ptr.hbm [resolvable:$true] %s134_s30 }
  0x10   :  { %v70_v5 = vld [vmem:[#allocation5 + $0x58] sm:$0xff]  ;;  %v67_v6 = vld [vmem:[#allocation5 + $0x40] sm:$0xff]  ;;  %v68_v7 = vld [vmem:[#allocation5 + $0x48] sm:$0xff] }
  0x11   :  { %94 = vmatpush.msra.mxu0 %v71_v2  ;;  %114 = vmatpush.msra.mxu1 %v72_v3  ;;  %v65_v8 = vld [vmem:[#allocation5 + $0x30] sm:$0xff]  ;;  %v66_v9 = vld [vmem:[#allocation5 + $0x38] sm:$0xff]  ;;  %v63_v10 = vld [vmem:[#allocation5 + $0x20] sm:$0xff] }
  0x12   :  { %v64_v11 = vld [vmem:[#allocation5 + $0x28] sm:$0xff]  ;;  %v61_v12 = vld [vmem:[#allocation5 + $0x10] sm:$0xff]  ;;  %v62_v13 = vld [vmem:[#allocation5 + $0x18] sm:$0xff] }
  0x13   :  { %95 = vmatpush.msra.mxu0 %v69_v4  ;;  %115 = vmatpush.msra.mxu1 %v70_v5  ;;  %v59_v14 = vld [vmem:[#allocation5] sm:$0xff]  ;;  %v60_v15 = vld [vmem:[#allocation5 + $0x8] sm:$0xff]  ;;  %v58_v16 = vld [vmem:[#allocation2] sm:$0xff] }
  0x14   :  { %v75_v17 = vld [vmem:[#allocation7] sm:$0x3] }
  0x15   :  { %96 = vmatpush.msra.mxu0 %v67_v6  ;;  %116 = vmatpush.msra.mxu1 %v68_v7  ;;  %v77_v18 = vperm.slane %v75_v17, 0  ;;  %v78_v19 = vperm.slane %v75_v17, 1 }
  0x17   :  { %97 = vmatpush.msra.mxu0 %v65_v8  ;;  %117 = vmatpush.msra.mxu1 %v66_v9 }
  0x19   :  { %98 = vmatpush.msra.mxu0 %v63_v10  ;;  %118 = vmatpush.msra.mxu1 %v64_v11 }
  0x1b   :  { %99 = vmatpush.msra.mxu0 %v61_v12  ;;  %119 = vmatpush.msra.mxu1 %v62_v13 }
  0x1d   :  { %100 = vmatpush.msra.mxu0 %v59_v14  ;;  %120 = vmatpush.msra.mxu1 %v60_v15 }
  0x1e   :  { %145 = vmatmul.msk.f32.vlgmr.msra.gmra.mxu0 %vm81_vm0, %v58_v16  ;;  %146 = vmatmul.msk.f32.vlgmr.msra.gmra.mxu1 %vm81_vm0, %v58_v16 }
  0x9b   :  { %v102_v20 = vpop.f32.mrf.mxu0  ;;  %v122_v21 = vpop.f32.mrf.mxu1 }
  0x9c   :  { %v103_v22 = vadd.f32 %v102_v20, %v77_v18  ;;  %v123_v23 = vadd.f32 %v122_v21, %v78_v19 }
  0x9e   :  { %125 = vst [vmem:[#allocation8] sm:$0xff] %v103_v22 }
  0x9f   :  { %126 = vst [vmem:[#allocation8 + $0x8] sm:$0xff] %v123_v23 }
  0xa0   :  { %137 = dma.vmem_to_hbm [thread:$0]  %s133_s2, 256, %s135_s30, [#allocation4]  }
  0xa1   :  { %253 = dma.done.wait [#allocation4], 256  }
  0xa2   :  { %254 = vsyncadd [#allocation4], 4294967040 }
  0xa3   :  { %142 = vsyncpa [#allocation3], 1 }
  0xa4   :  { %143 = vsyncpa [#allocation6], 1 }
  0xa5   :  { %144 = vsyncpa [#allocation4], 1 }

</bundles_post_ra>
